<compile_context>
chip_gen: v6e
topology: v6e:2x2x1
jax: 0.10.0
libtpu: 0.0.40
codegen_flags: <defaults>
</compile_context>

<pallas_src>
import jax
import jax.numpy as jnp
from jax import lax
from jax.experimental import pallas as pl
from jax.experimental.pallas import tpu as pltpu


def _round_up(x: int, m: int) -> int:
    return (x + m - 1) // m * m


def _backbone_update_kernel(s_ref, w_ref, b_ref, eps_ref, out_ref):
    s = s_ref[...]                      # [TILE_M, c_s]   (native dtype)
    w = w_ref[...]                      # [12, c_s]       (same dtype as s)

    # Fused matmul, transposed output: y_t[o, m] = sum_c w[o, c] * s[m, c] + b[o]
    y = lax.dot_general(
        w, s,
        dimension_numbers=(((1,), (1,)), ((), ())),
        preferred_element_type=jnp.float32,
    )                                   # [12, TILE_M], f32 accumulation
    y = y + b_ref[...]                  # b: [12, 1] broadcast over lanes

    mean = y[0:6, :]                    # [6, TILE_M]
    logvar = y[6:12, :]                 # [6, TILE_M]
    std = jnp.exp(0.5 * logvar)         # f32 transcendental (EUP)

    out_ref[...] = (eps_ref[...] * std + mean).astype(out_ref.dtype)


def backbone_update(s, weight, bias, eps):
    """s: [*, N_res, C_s]; weight: [12, C_s]; bias: [12]; eps: [*, N_res, 6]."""
    *lead, c_s = s.shape
    M = 1
    for d in lead:
        M *= d

    # Row tiling: multiple of 128 so eps/out blocks (last dim = TILE_M) are
    # lane-dense; cap at 1024 rows (well under the 32 MiB scoped VMEM default
    # even double-buffered with large c_s, and fine on v7x's 64 MiB VMEM).
    tile_m = min(1024, _round_up(max(M, 1), 128))
    m_pad = _round_up(M, tile_m)

    s2 = s.reshape(M, c_s)                               # native dtype, no upcast
    w = weight.astype(s2.dtype)                          # [12, c_s]
    b_col = bias.astype(jnp.float32).reshape(12, 1)      # [12, 1]
    eps_t = eps.reshape(M, 6).astype(jnp.float32).T      # [6, M] (tiny transpose)

    if m_pad != M:
        s2 = jnp.pad(s2, ((0, m_pad - M), (0, 0)))
        eps_t = jnp.pad(eps_t, ((0, 0), (0, m_pad - M)))

    itemsize = jnp.dtype(s2.dtype).itemsize
    cost = pl.CostEstimate(
        flops=2 * M * c_s * 12,
        transcendentals=6 * M,
        bytes_accessed=int(M * c_s * itemsize + 12 * c_s * itemsize
                           + M * 6 * 4 + M * 6 * itemsize),
    )

    out_t = pl.pallas_call(
        _backbone_update_kernel,
        out_shape=jax.ShapeDtypeStruct((6, m_pad), s2.dtype),
        grid=(m_pad // tile_m,),
        in_specs=[
            pl.BlockSpec((tile_m, c_s), lambda i: (i, 0)),  # s row-tile
            pl.BlockSpec((12, c_s), lambda i: (0, 0)),      # fused weight (const)
            pl.BlockSpec((12, 1), lambda i: (0, 0)),        # bias column (const)
            pl.BlockSpec((6, tile_m), lambda i: (0, i)),    # eps (transposed)
        ],
        out_specs=pl.BlockSpec((6, tile_m), lambda i: (0, i)),
        compiler_params=pltpu.CompilerParams(
            dimension_semantics=("parallel",)),
        cost_estimate=cost,
    )(s2, w, b_col, eps_t)

    out = out_t.T[:M]                                    # [M, 6]
    return out.reshape(*lead, 6)


def _reference(s, weight, bias, eps):
    y = jnp.einsum("...c,oc->...o",
                   s.astype(jnp.float32), weight.astype(jnp.float32)) + bias
    mean, logvar = y[..., :6], y[..., 6:]
    return eps * jnp.exp(0.5 * logvar) + mean


if __name__ == "__main__":
    c_s = 32
    batch, n_res = 2, 8

    key = jax.random.PRNGKey(0)
    k_s, k_w, k_b, k_eps = jax.random.split(key, 4)

    # Deterministic parameter init (nn.Linear(c_s, 12) shapes, PyTorch layout).
    weight = jax.random.normal(k_w, (12, c_s), dtype=jnp.float32) * 0.1
    bias = jax.random.normal(k_b, (12,), dtype=jnp.float32) * 0.1

    # Inputs.
    s = jax.random.normal(k_s, (batch, n_res, c_s), dtype=jnp.float32)
    # eps ~ N(0,1), same shape as mean (randn_like in the PyTorch module).
    eps = jax.random.normal(k_eps, (batch, n_res, 6), dtype=jnp.float32)

    out = backbone_update(s, weight, bias, eps)
    out = jax.block_until_ready(out)

    ref = _reference(s, weight, bias, eps)
    assert out.shape == (batch, n_res, 6), out.shape
    assert jnp.allclose(out, ref, atol=1e-5, rtol=1e-5), "mismatch vs reference"

    print("KERNEL_OK")
</pallas_src>

<mosaic_0001>
module attributes {stable_mosaic.version = 11 : i64} {
  func.func @_backbone_update_kernel(%arg0: i32, %arg1: memref<128x32xf32, #tpu.memory_space<vmem>>, %arg2: memref<12x32xf32, #tpu.memory_space<vmem>>, %arg3: memref<12x1xf32, #tpu.memory_space<vmem>>, %arg4: memref<6x128xf32, #tpu.memory_space<vmem>>, %arg5: memref<6x128xf32, #tpu.memory_space<vmem>>) attributes {dimension_semantics = [#tpu.dimension_semantics<parallel>], iteration_bounds = array<i64: 1>, scalar_prefetch = 0 : i64, scratch_operands = 0 : i64, tpu.core_type = #tpu.core_type<tc>, window_params = [{transform_indices = @transform_0, window_bounds = array<i64: 128, 32>}, {pipeline_mode = #tpu.pipeline_mode<synchronous>, transform_indices = @transform_1, window_bounds = array<i64: 12, 32>}, {pipeline_mode = #tpu.pipeline_mode<synchronous>, transform_indices = @transform_2, window_bounds = array<i64: 12, 1>}, {transform_indices = @transform_3, window_bounds = array<i64: 6, 128>}, {transform_indices = @transform_4, window_bounds = array<i64: 6, 128>}]} {
    %c0 = arith.constant 0 : index
    %c0_0 = arith.constant 0 : index
    %0 = vector.load %arg1[%c0, %c0_0] : memref<128x32xf32, #tpu.memory_space<vmem>>, vector<128x32xf32>
    %c0_1 = arith.constant 0 : index
    %c0_2 = arith.constant 0 : index
    %1 = vector.load %arg2[%c0_1, %c0_2] : memref<12x32xf32, #tpu.memory_space<vmem>>, vector<12x32xf32>
    %cst = arith.constant dense<0.000000e+00> : vector<12x128xf32>
    %2 = tpu.matmul %1, %0, %cst {dimension_numbers = #tpu.dot_dimension_numbers<[1], [1], [0], [0], [0, 0, 1, 0], [], []>} : vector<12x32xf32>, vector<128x32xf32>, vector<12x128xf32> -> vector<12x128xf32>
    %c0_3 = arith.constant 0 : index
    %c0_4 = arith.constant 0 : index
    %3 = vector.load %arg3[%c0_3, %c0_4] : memref<12x1xf32, #tpu.memory_space<vmem>>, vector<12x1xf32>
    %4 = vector.broadcast %3 : vector<12x1xf32> to vector<12x128xf32>
    %5 = arith.addf %2, %4 : vector<12x128xf32>
    %6 = vector.extract_strided_slice %5 {offsets = [0, 0], sizes = [6, 128], strides = [1, 1]} : vector<12x128xf32> to vector<6x128xf32>
    %7 = vector.extract_strided_slice %5 {offsets = [6, 0], sizes = [6, 128], strides = [1, 1]} : vector<12x128xf32> to vector<6x128xf32>
    %cst_5 = arith.constant 5.000000e-01 : f32
    %8 = vector.broadcast %cst_5 : f32 to vector<6x128xf32>
    %9 = arith.mulf %8, %7 : vector<6x128xf32>
    %10 = math.exp %9 : vector<6x128xf32>
    %c0_6 = arith.constant 0 : index
    %c0_7 = arith.constant 0 : index
    %11 = vector.load %arg4[%c0_6, %c0_7] : memref<6x128xf32, #tpu.memory_space<vmem>>, vector<6x128xf32>
    %12 = arith.mulf %11, %10 : vector<6x128xf32>
    %13 = arith.addf %12, %6 : vector<6x128xf32>
    %c0_8 = arith.constant 0 : index
    %c0_9 = arith.constant 0 : index
    %14 = vector.load %arg5[%c0_8, %c0_9] : memref<6x128xf32, #tpu.memory_space<vmem>>, vector<6x128xf32>
    tpu.vector_store %arg5[%c0_8, %c0_9], %13 {strides = array<i32>} : memref<6x128xf32, #tpu.memory_space<vmem>>, vector<6x128xf32>,
    return
  }
  func.func @transform_0(%arg0: i32) -> (i32, i32) {
    %c0_i32 = arith.constant 0 : i32
    %c0_i32_0 = arith.constant 0 : i32
    return %arg0, %c0_i32 : i32, i32
  }
  func.func @transform_1(%arg0: i32) -> (i32, i32) {
    %c0_i32 = arith.constant 0 : i32
    %c0_i32_0 = arith.constant 0 : i32
    %c0_i32_1 = arith.constant 0 : i32
    return %c0_i32, %c0_i32_0 : i32, i32
  }
  func.func @transform_2(%arg0: i32) -> (i32, i32) {
    %c0_i32 = arith.constant 0 : i32
    %c0_i32_0 = arith.constant 0 : i32
    %c0_i32_1 = arith.constant 0 : i32
    return %c0_i32, %c0_i32_0 : i32, i32
  }
  func.func @transform_3(%arg0: i32) -> (i32, i32) {
    %c0_i32 = arith.constant 0 : i32
    %c0_i32_0 = arith.constant 0 : i32
    return %c0_i32, %arg0 : i32, i32
  }
  func.func @transform_4(%arg0: i32) -> (i32, i32) {
    %c0_i32 = arith.constant 0 : i32
    %c0_i32_0 = arith.constant 0 : i32
    return %c0_i32, %arg0 : i32, i32
  }
}

</mosaic_0001>

<bundles_post_ra>
// kernel: tpu_custom_call.1
= control target key start
LH: loop header
LB: loop body
LE: loop exit
PB: predicated region body
PF: predicated region fallthrough
CT: control target
= control target key end

     0   :  { %vm48_vm0 = vcmask 261120   ;;  %v309_v2 = vmov 0   ;;  %s436_s0 = inlined_call_operand.vmem [shape: f32[128,32], index: 0, kind: input, shape index: {}]   ;;  %s437_s1 = inlined_call_operand.vmem [shape: f32[12,32], index: 1, kind: input, shape index: {}]   ;;  %s438_s2 = inlined_call_operand.vmem [shape: f32[12,1], index: 2, kind: input, shape index: {}]   ;;  %s439_s3 = inlined_call_operand.vmem [shape: f32[6,128], index: 3, kind: input, shape index: {}]   ;;  %s440_s4 = inlined_call_operand.hbm [shape: f32[6,128], index: 4, kind: output, shape index: {}]  }
   0x1   :  { %v33_v0 = vld [vmem:[%s436_s0 + $0x78] sm:$0xff]  ;;  %v32_v1 = vld [vmem:[%s436_s0 + $0x70] sm:$0xff]  ;;  %282 = vset.pattern.permute.xlu0 %v309_v2  ;;  %v31_v3 = vld [vmem:[%s436_s0 + $0x68] sm:$0xff] }
   0x2   :  { %245 = vmatprep.subr.msk.mxu0 %vm48_vm0, %v33_v0  ;;  %v34_v4 = vld [vmem:[%s437_s1] sm:$0xff] }
   0x3   :  { %246 = vmatpush3.xpose.msk.msra.mxu0 %vm48_vm0, %v33_v0  ;;  %277 = vmatprep.mubr.msk.f32.mxu0 %vm48_vm0, %v34_v4  ;;  %v36_v5 = vld [vmem:[%s438_s2] sm:$0xff] }
   0x4   :  { %247 = vmatprep.subr.msk.mxu0 %vm48_vm0, %v32_v1 }
   0x7   :  { %248 = vmatpush3.xpose.msk.msra.mxu0 %vm48_vm0, %v32_v1 }
   0x8   :  { %9 = vsyncpa [#allocation3], 0  ;;  %249 = vmatprep.subr.msk.mxu0 %vm48_vm0, %v31_v3  ;;  %40 = vperm.xlu0 %282, %v36_v5   ;;  %v30_v6 = vld [vmem:[%s436_s0 + $0x60] sm:$0xff]  ;;  %v37_v7 = vld [vmem:[%s438_s2 + $0x8] sm:$0xf]  ;;  %vm187_vm1 = vcmask 1041408  }
   0x9   :  { %v29_v8 = vld [vmem:[%s436_s0 + $0x58] sm:$0xff]  ;;  %v28_v9 = vld [vmem:[%s436_s0 + $0x50] sm:$0xff]  ;;  %v27_v10 = vld [vmem:[%s436_s0 + $0x48] sm:$0xff]  ;;  %s310_s28 = smov [#allocation2]  }
   0xa   :  { %v26_v11 = vld [vmem:[%s436_s0 + $0x40] sm:$0xff]  ;;  %v25_v12 = vld [vmem:[%s436_s0 + $0x38] sm:$0xff]  ;;  %v24_v13 = vld [vmem:[%s436_s0 + $0x30] sm:$0xff]  ;;  %s201_s29 = sshll.u32 %s310_s28, 4  ;;  %s202_s29 = int_to_ptr.vmem [resolvable:$true] %s201_s29 }
   0xb   :  { %250 = vmatpush3.xpose.msk.msra.mxu0 %vm48_vm0, %v31_v3  ;;  %v23_v14 = vld [vmem:[%s436_s0 + $0x28] sm:$0xff]  ;;  %v22_v15 = vld [vmem:[%s436_s0 + $0x20] sm:$0xff]  ;;  %v21_v16 = vld [vmem:[%s436_s0 + $0x18] sm:$0xff]  ;;  %s287_s30 = scalar_lea.vmem %s202_s29, 128  ;;  %p292_p1 = scmp.lt.s32.totalorder %s202_s29, %s202_s29 }
   0xc   :  { %251 = vmatprep.subr.msk.mxu0 %vm48_vm0, %v30_v6  ;;  %45 = vperm.xlu0 %282, %v37_v7   ;;  %v20_v17 = vld [vmem:[%s436_s0 + $0x10] sm:$0xff]  ;;  %v19_v18 = vld [vmem:[%s436_s0 + $0x8] sm:$0xff]  ;;  %v18_v19 = vld [vmem:[%s436_s0] sm:$0xff]  ;;  %p288_p0 = scmp.ne.s32.totalorder %s202_s29, %s287_s30  ;;  %p293_p2 = scmp.lt.s32.totalorder %s287_s30, %s287_s30 }
   0xd   :  { %v35_v20 = vld [vmem:[%s437_s1 + $0x8] sm:$0xf]  ;;  %v184_v35 = vld [vmem:[%s439_s3] sm:$0x3f] }
   0xe   :  { %p294_p3 = por %p293_p2, %p292_p1 }
   0xf   :  { %252 = vmatpush3.xpose.msk.msra.mxu0 %vm48_vm0, %v30_v6 }
  0x10   :  { %253 = vmatprep.subr.msk.mxu0 %vm48_vm0, %v29_v8  ;;  %p295_p4 = pnand %p294_p3, %p288_p0 }
  0x13   :  { %254 = vmatpush3.xpose.msk.msra.mxu0 %vm48_vm0, %v29_v8 }
  0x14   :  { %255 = vmatprep.subr.msk.mxu0 %vm48_vm0, %v28_v9 }
  0x17   :  { %256 = vmatpush3.xpose.msk.msra.mxu0 %vm48_vm0, %v28_v9 }
  0x18   :  { %257 = vmatprep.subr.msk.mxu0 %vm48_vm0, %v27_v10 }
  0x1b   :  { %258 = vmatpush3.xpose.msk.msra.mxu0 %vm48_vm0, %v27_v10 }
  0x1c   :  { %259 = vmatprep.subr.msk.mxu0 %vm48_vm0, %v26_v11 }
  0x1f   :  { %260 = vmatpush3.xpose.msk.msra.mxu0 %vm48_vm0, %v26_v11 }
  0x20   :  { %261 = vmatprep.subr.msk.mxu0 %vm48_vm0, %v25_v12 }
  0x23   :  { %262 = vmatpush3.xpose.msk.msra.mxu0 %vm48_vm0, %v25_v12 }
  0x24   :  { %263 = vmatprep.subr.msk.mxu0 %vm48_vm0, %v24_v13 }
  0x27   :  { %264 = vmatpush3.xpose.msk.msra.mxu0 %vm48_vm0, %v24_v13 }
  0x28   :  { %265 = vmatprep.subr.msk.mxu0 %vm48_vm0, %v23_v14 }
  0x2b   :  { %266 = vmatpush3.xpose.msk.msra.mxu0 %vm48_vm0, %v23_v14 }
  0x2c   :  { %267 = vmatprep.subr.msk.mxu0 %vm48_vm0, %v22_v15 }
  0x2f   :  { %268 = vmatpush3.xpose.msk.msra.mxu0 %vm48_vm0, %v22_v15 }
  0x30   :  { %269 = vmatprep.subr.msk.mxu0 %vm48_vm0, %v21_v16 }
  0x33   :  { %270 = vmatpush3.xpose.msk.msra.mxu0 %vm48_vm0, %v21_v16 }
  0x34   :  { %271 = vmatprep.subr.msk.mxu0 %vm48_vm0, %v20_v17 }
  0x37   :  { %272 = vmatpush3.xpose.msk.msra.mxu0 %vm48_vm0, %v20_v17 }
  0x38   :  { %273 = vmatprep.subr.msk.mxu0 %vm48_vm0, %v19_v18 }
  0x3b   :  { %274 = vmatpush3.xpose.msk.msra.mxu0 %vm48_vm0, %v19_v18 }
  0x3c   :  { %275 = vmatprep.subr.msk.mxu0 %vm48_vm0, %v18_v19 }
  0x3f   :  { %276 = vmatpush3.xpose.msk.msra.mxu0 %vm48_vm0, %v18_v19 }
  0x42   :  { %278 = vmatmul.mubr.msk.f32.vlgmr.msra.gmra.mxu0 %vm48_vm0, %v35_v20 }
  0x83   :  { %v41_v21 = vpop.permute.xlu0 %40 }
  0x87   :  { %v46_v22 = vpop.permute.xlu0 %45 }
 0x102   :  { %v279_v23 = vpop.f32.mrf.mxu0 }
 0x103   :  { %v175_v24 = vadd.f32 %v279_v23, %v46_v22 }
 0x104   :  { %v169_v25 = vpop.f32.mrf.mxu0 }
 0x105   :  { %v179_v26 = vmul.f32 0.5, %v175_v24  ;;  %v170_v27 = vadd.f32 %v169_v25, %v41_v21 }
 0x107   :  { %v182_v28 = vmul.f32 1.442695, %v179_v26  ;;  %v178_v29 = vmul.f32 0.5, %v170_v27 }
 0x109   :  { %283 = vpow2.f32 %v182_v28  ;;  %v180_v30 = vmul.f32 1.442695, %v178_v29 }
 0x10b   :  { %285 = vpow2.f32 %v180_v30 }
 0x116   :  { %v284_v31 = vpop.eup %283 }
 0x117   :  { %v189_v33 = vrot.slane %v284_v31, 6 }
 0x118   :  { %v286_v32 = vpop.eup %285 }
 0x119   :  { %v188_v34 = vrot.slane %v286_v32, 6 }
 0x11b   :  { %v190_v36 = vsel %vm187_vm1, %v188_v34, %v189_v33 }
 0x11c   :  { %v192_v37 = vmul.f32 %v190_v36, %v184_v35 }
 0x11e   :  { %v193_v38 = vadd.f32 %v192_v37, %v170_v27 }
 0x120   :  { %194 = vst [vmem:[#allocation2] sm:$0x3f] %v193_v38 }
 0x121   :  { %298 = shalt.err (!%p295_p4)
}
 0x122   :  { %204 = dma.vmem_to_hbm [thread:$0]  %s202_s29, 128, %s440_s4, [#allocation3]  }
 0x123   :  { %307 = dma.done.wait [#allocation3], 128  }
 0x124   :  { %308 = vsyncadd [#allocation3], 4294967168 }
 0x125   :  { %208 = vsyncpa [#allocation3], 1 }

</bundles_post_ra>
